<compile_context>
chip_gen: v5e
topology: v5e:2x2
jax: 0.10.0
libtpu: 0.0.40
codegen_flags: <defaults>
</compile_context>

<pallas_src>
import jax
import jax.numpy as jnp
import numpy as np
from jax.experimental import pallas as pl
from jax.experimental.pallas import tpu as pltpu


def _round_up(n, m):
    return ((n + m - 1) // m) * m


# ----------------------------------------------------------------------------
# Parameter init (deterministic, mirrors torch.nn.Linear + xavier_uniform_)
# Weights are kept in the torch layout [d_out, d_in]; biases as [d_out, 1].
# ----------------------------------------------------------------------------
def init_linear(key, d_in, d_out, dtype=jnp.float32):
    kw, kb = jax.random.split(key)
    bound_w = float(np.sqrt(6.0 / (d_in + d_out)))      # xavier_uniform_
    w = jax.random.uniform(kw, (d_out, d_in), dtype, -bound_w, bound_w)
    bound_b = float(1.0 / np.sqrt(d_in))                # torch default bias init
    b = jax.random.uniform(kb, (d_out, 1), dtype, -bound_b, bound_b)
    return w, b


def build_ae_params(key, encoder_sizes, decoder_sizes):
    pairs = []
    for i in range(len(encoder_sizes) - 1):
        pairs.append((encoder_sizes[i], encoder_sizes[i + 1]))
    for i in range(len(decoder_sizes) - 1):
        pairs.append((decoder_sizes[i], decoder_sizes[i + 1]))
    keys = jax.random.split(key, len(pairs))
    return [init_linear(k, d_in, d_out) for k, (d_in, d_out) in zip(keys, pairs)]


# ----------------------------------------------------------------------------
# Host-side algebraic fold: Linear(act=False) followed by Linear collapses to
# one Linear:  W2 @ (W1 h + b1) + b2 = (W2 W1) h + (W2 b1 + b2).
# ----------------------------------------------------------------------------
def fold_linear_chain(params, activation_flags):
    params = list(params)
    flags = list(activation_flags)
    out_p, out_f = [], []
    i = 0
    while i < len(params):
        w, b = params[i]
        act = flags[i]
        while (not act) and (i + 1 < len(params)):
            w2, b2 = params[i + 1]
            w = w2 @ w            # [d2_out, d_in]
            b = w2 @ b + b2       # [d2_out, 1]
            act = flags[i + 1]
            i += 1
        out_p.append((w, b))
        out_f.append(act)
        i += 1
    return out_p, out_f


# ----------------------------------------------------------------------------
# Fused Pallas kernel: whole (folded) encoder+decoder chain, one batch tile.
# Activations live as [D, TILE_B]: lane axis = batch (lane-dense stores).
# ----------------------------------------------------------------------------
def make_ae_kernel(activation_flags):
    n_layers = len(activation_flags)

    def kernel(x_ref, *refs):
        # refs = (w0, b0, w1, b1, ..., w_{n-1}, b_{n-1}, out_ref)
        out_ref = refs[-1]
        param_refs = refs[:-1]
        h = x_ref[...]                                  # [d_in, TILE_B]
        for i in range(n_layers):
            w = param_refs[2 * i][...]                  # [d_out, d_in]
            b = param_refs[2 * i + 1][...]              # [d_out, TILE_B]
            h = jnp.dot(w, h, preferred_element_type=jnp.float32) + b
            if activation_flags[i]:
                h = jnp.maximum(h, 0.0)
        out_ref[...] = h.astype(out_ref.dtype)

    return kernel


def ae_forward(x, params, activation_flags, tile_b=512):
    """x: [B, D_in] f32. params: list of (W [d_out, d_in], b [d_out, 1])."""
    B = x.shape[0]
    d_in0 = params[0][0].shape[1]
    assert x.shape[1] == d_in0

    # Fold no-activation Linear pairs (shortens the serial matmul chain).
    fparams, fflags = fold_linear_chain(params, activation_flags)
    d_out_final = fparams[-1][0].shape[0]

    # Batch tiling: lane axis must be a multiple of 128; pad B up if needed.
    tile_b = max(128, min(int(tile_b), _round_up(B, 128)))
    b_pad = _round_up(B, tile_b)
    if b_pad != B:
        x = jnp.pad(x, ((0, b_pad - B), (0, 0)))

    # Lane-dense layout: batch on the 128-lane axis (layout plumbing only).
    x_t = x.T                                           # [d_in0, b_pad]
    grid = (b_pad // tile_b,)

    flat_args = [x_t]
    in_specs = [pl.BlockSpec((d_in0, tile_b), lambda i: (0, i))]
    for w, b in fparams:
        d_out = w.shape[0]
        b_full = jnp.broadcast_to(b, (d_out, tile_b))   # plain VPU add in-kernel
        flat_args += [w, b_full]
        in_specs += [
            pl.BlockSpec(w.shape, lambda i: (0, 0)),            # VMEM-resident
            pl.BlockSpec((d_out, tile_b), lambda i: (0, 0)),    # across the grid
        ]
    out_spec = pl.BlockSpec((d_out_final, tile_b), lambda i: (0, i))

    # Advisory cost estimate so XLA can overlap this small custom call.
    flops = 2 * b_pad * sum(w.shape[0] * w.shape[1] for w, _ in fparams)
    bytes_accessed = sum(int(np.prod(a.shape)) * a.dtype.itemsize
                         for a in flat_args)
    bytes_accessed += d_out_final * b_pad * x.dtype.itemsize
    cost = pl.CostEstimate(flops=flops, transcendentals=0,
                           bytes_accessed=bytes_accessed)

    out_t = pl.pallas_call(
        make_ae_kernel(tuple(fflags)),
        out_shape=jax.ShapeDtypeStruct((d_out_final, b_pad), x.dtype),
        grid=grid,
        in_specs=in_specs,
        out_specs=out_spec,
        compiler_params=pltpu.CompilerParams(
            dimension_semantics=("parallel",)),
        cost_estimate=cost,
    )(*flat_args)

    return out_t.T[:B]                                  # back to [B, d_out]


# ----------------------------------------------------------------------------
# Pure-JAX reference (mirrors the PyTorch forward exactly, no folding)
# ----------------------------------------------------------------------------
def ae_forward_ref(x, params, activation_flags):
    h = x
    for (w, b), act in zip(params, activation_flags):
        h = h @ w.T + b.T
        if act:
            h = jnp.maximum(h, 0.0)
    return h


if __name__ == "__main__":
    # Architecture consistent with the module: symmetric MLP autoencoder.
    encoderSizeList = [32, 16, 8]
    decoderSizeList = [8, 16, 32]
    encoderActivationList = [True, False]    # ReLU after first enc layer only
    decoderActivationList = [True, False]    # ReLU after first dec layer only
    activation_flags = list(encoderActivationList) + list(decoderActivationList)

    key = jax.random.PRNGKey(0)
    kx, kp = jax.random.split(key)

    B = 200                                  # exercises batch tiling + padding
    x = jax.random.normal(kx, (B, encoderSizeList[0]), dtype=jnp.float32)
    params = build_ae_params(kp, encoderSizeList, decoderSizeList)

    out = jax.block_until_ready(ae_forward(x, params, activation_flags, tile_b=128))
    ref = jax.block_until_ready(ae_forward_ref(x, params, activation_flags))

    if not np.allclose(np.asarray(out), np.asarray(ref), rtol=1e-4, atol=1e-4):
        raise AssertionError("Pallas AE output mismatch vs reference")

    print("KERNEL_OK")
</pallas_src>

<mosaic_0001>
module attributes {stable_mosaic.version = 11 : i64} {
  func.func @kernel(%arg0: i32, %arg1: memref<32x128xf32, #tpu.memory_space<vmem>>, %arg2: memref<16x32xf32, #tpu.memory_space<vmem>>, %arg3: memref<16x128xf32, #tpu.memory_space<vmem>>, %arg4: memref<16x16xf32, #tpu.memory_space<vmem>>, %arg5: memref<16x128xf32, #tpu.memory_space<vmem>>, %arg6: memref<32x16xf32, #tpu.memory_space<vmem>>, %arg7: memref<32x128xf32, #tpu.memory_space<vmem>>, %arg8: memref<32x128xf32, #tpu.memory_space<vmem>>) attributes {dimension_semantics = [#tpu.dimension_semantics<parallel>], iteration_bounds = array<i64: 2>, scalar_prefetch = 0 : i64, scratch_operands = 0 : i64, tpu.core_type = #tpu.core_type<tc>, window_params = [{transform_indices = @transform_0, window_bounds = array<i64: 32, 128>}, {pipeline_mode = #tpu.pipeline_mode<synchronous>, transform_indices = @transform_1, window_bounds = array<i64: 16, 32>}, {pipeline_mode = #tpu.pipeline_mode<synchronous>, transform_indices = @transform_2, window_bounds = array<i64: 16, 128>}, {pipeline_mode = #tpu.pipeline_mode<synchronous>, transform_indices = @transform_3, window_bounds = array<i64: 16, 16>}, {pipeline_mode = #tpu.pipeline_mode<synchronous>, transform_indices = @transform_4, window_bounds = array<i64: 16, 128>}, {pipeline_mode = #tpu.pipeline_mode<synchronous>, transform_indices = @transform_5, window_bounds = array<i64: 32, 16>}, {pipeline_mode = #tpu.pipeline_mode<synchronous>, transform_indices = @transform_6, window_bounds = array<i64: 32, 128>}, {transform_indices = @transform_7, window_bounds = array<i64: 32, 128>}]} {
    %c0 = arith.constant 0 : index
    %c0_0 = arith.constant 0 : index
    %0 = vector.load %arg1[%c0, %c0_0] : memref<32x128xf32, #tpu.memory_space<vmem>>, vector<32x128xf32>
    %c0_1 = arith.constant 0 : index
    %c0_2 = arith.constant 0 : index
    %1 = vector.load %arg2[%c0_1, %c0_2] : memref<16x32xf32, #tpu.memory_space<vmem>>, vector<16x32xf32>
    %c0_3 = arith.constant 0 : index
    %c0_4 = arith.constant 0 : index
    %2 = vector.load %arg3[%c0_3, %c0_4] : memref<16x128xf32, #tpu.memory_space<vmem>>, vector<16x128xf32>
    %cst = arith.constant dense<0.000000e+00> : vector<16x128xf32>
    %3 = tpu.matmul %1, %0, %cst {dimension_numbers = #tpu.dot_dimension_numbers<[1], [0], [0], [1], [0, 0, 1, 1], [], []>} : vector<16x32xf32>, vector<32x128xf32>, vector<16x128xf32> -> vector<16x128xf32>
    %4 = arith.addf %3, %2 : vector<16x128xf32>
    %cst_5 = arith.constant 0.000000e+00 : f32
    %5 = vector.broadcast %cst_5 : f32 to vector<16x128xf32>
    %6 = arith.maximumf %4, %5 : vector<16x128xf32>
    %c0_6 = arith.constant 0 : index
    %c0_7 = arith.constant 0 : index
    %7 = vector.load %arg4[%c0_6, %c0_7] : memref<16x16xf32, #tpu.memory_space<vmem>>, vector<16x16xf32>
    %c0_8 = arith.constant 0 : index
    %c0_9 = arith.constant 0 : index
    %8 = vector.load %arg5[%c0_8, %c0_9] : memref<16x128xf32, #tpu.memory_space<vmem>>, vector<16x128xf32>
    %cst_10 = arith.constant dense<0.000000e+00> : vector<16x128xf32>
    %9 = tpu.matmul %7, %6, %cst_10 {dimension_numbers = #tpu.dot_dimension_numbers<[1], [0], [0], [1], [0, 0, 1, 1], [], []>} : vector<16x16xf32>, vector<16x128xf32>, vector<16x128xf32> -> vector<16x128xf32>
    %10 = arith.addf %9, %8 : vector<16x128xf32>
    %cst_11 = arith.constant 0.000000e+00 : f32
    %11 = vector.broadcast %cst_11 : f32 to vector<16x128xf32>
    %12 = arith.maximumf %10, %11 : vector<16x128xf32>
    %c0_12 = arith.constant 0 : index
    %c0_13 = arith.constant 0 : index
    %13 = vector.load %arg6[%c0_12, %c0_13] : memref<32x16xf32, #tpu.memory_space<vmem>>, vector<32x16xf32>
    %c0_14 = arith.constant 0 : index
    %c0_15 = arith.constant 0 : index
    %14 = vector.load %arg7[%c0_14, %c0_15] : memref<32x128xf32, #tpu.memory_space<vmem>>, vector<32x128xf32>
    %cst_16 = arith.constant dense<0.000000e+00> : vector<32x128xf32>
    %15 = tpu.matmul %13, %12, %cst_16 {dimension_numbers = #tpu.dot_dimension_numbers<[1], [0], [0], [1], [0, 0, 1, 1], [], []>} : vector<32x16xf32>, vector<16x128xf32>, vector<32x128xf32> -> vector<32x128xf32>
    %16 = arith.addf %15, %14 : vector<32x128xf32>
    %c0_17 = arith.constant 0 : index
    %c0_18 = arith.constant 0 : index
    %17 = vector.load %arg8[%c0_17, %c0_18] : memref<32x128xf32, #tpu.memory_space<vmem>>, vector<32x128xf32>
    tpu.vector_store %arg8[%c0_17, %c0_18], %16 {strides = array<i32>} : memref<32x128xf32, #tpu.memory_space<vmem>>, vector<32x128xf32>,
    return
  }
  func.func @transform_0(%arg0: i32) -> (i32, i32) {
    %c0_i32 = arith.constant 0 : i32
    %c0_i32_0 = arith.constant 0 : i32
    return %c0_i32, %arg0 : i32, i32
  }
  func.func @transform_1(%arg0: i32) -> (i32, i32) {
    %c0_i32 = arith.constant 0 : i32
    %c0_i32_0 = arith.constant 0 : i32
    %c0_i32_1 = arith.constant 0 : i32
    return %c0_i32, %c0_i32_0 : i32, i32
  }
  func.func @transform_2(%arg0: i32) -> (i32, i32) {
    %c0_i32 = arith.constant 0 : i32
    %c0_i32_0 = arith.constant 0 : i32
    %c0_i32_1 = arith.constant 0 : i32
    return %c0_i32, %c0_i32_0 : i32, i32
  }
  func.func @transform_3(%arg0: i32) -> (i32, i32) {
    %c0_i32 = arith.constant 0 : i32
    %c0_i32_0 = arith.constant 0 : i32
    %c0_i32_1 = arith.constant 0 : i32
    return %c0_i32, %c0_i32_0 : i32, i32
  }
  func.func @transform_4(%arg0: i32) -> (i32, i32) {
    %c0_i32 = arith.constant 0 : i32
    %c0_i32_0 = arith.constant 0 : i32
    %c0_i32_1 = arith.constant 0 : i32
    return %c0_i32, %c0_i32_0 : i32, i32
  }
  func.func @transform_5(%arg0: i32) -> (i32, i32) {
    %c0_i32 = arith.constant 0 : i32
    %c0_i32_0 = arith.constant 0 : i32
    %c0_i32_1 = arith.constant 0 : i32
    return %c0_i32, %c0_i32_0 : i32, i32
  }
  func.func @transform_6(%arg0: i32) -> (i32, i32) {
    %c0_i32 = arith.constant 0 : i32
    %c0_i32_0 = arith.constant 0 : i32
    %c0_i32_1 = arith.constant 0 : i32
    return %c0_i32, %c0_i32_0 : i32, i32
  }
  func.func @transform_7(%arg0: i32) -> (i32, i32) {
    %c0_i32 = arith.constant 0 : i32
    %c0_i32_0 = arith.constant 0 : i32
    return %c0_i32, %arg0 : i32, i32
  }
}

</mosaic_0001>

<bundles_post_ra>
// kernel: tpu_custom_call.1
= control target key start
LH: loop header
LB: loop body
LE: loop exit
PB: predicated region body
PF: predicated region fallthrough
CT: control target
= control target key end

     0   :  { %s1161_s0 = inlined_call_operand.hbm [shape: f32[32,256], index: 0, kind: input, shape index: {}]   ;;  %s1162_s1 = inlined_call_operand.vmem [shape: f32[16,32], index: 1, kind: input, shape index: {}]   ;;  %s1163_s2 = inlined_call_operand.hbm [shape: f32[16,128], index: 2, kind: input, shape index: {}]   ;;  %s1164_s3 = inlined_call_operand.hbm [shape: f32[16,16], index: 3, kind: input, shape index: {}]   ;;  %s1165_s4 = inlined_call_operand.hbm [shape: f32[16,128], index: 4, kind: input, shape index: {}]   ;;  %s1166_s5 = inlined_call_operand.vmem [shape: f32[32,16], index: 5, kind: input, shape index: {}]   ;;  %s1167_s6 = inlined_call_operand.vmem [shape: f32[32,128], index: 6, kind: input, shape index: {}]   ;;  %s1168_s7 = inlined_call_operand.hbm [shape: f32[32,256], index: 7, kind: output, shape index: {}]  }
   0x1   :  { %1171 = sst [smem:[#allocation15_spill]] %s1163_s2 }
   0x2   :  { %1172 = sst [smem:[#allocation16_spill]] %s1164_s3 }
   0x3   :  { %12 = vsyncpa [#allocation3], 0 }
   0x4   :  { %14 = vsyncpa [#allocation3 + $0x1], 0 }
   0x5   :  { %15 = vsyncpa [#allocation6], 0 }
   0x6   :  { %16 = vsyncpa [#allocation9], 0 }
   0x7   :  { %17 = vsyncpa [#allocation4], 0 }
   0x8   :  { %19 = vsyncpa [#allocation4 + $0x1], 0  ;;  %s950_s24 = smov 0   ;;  %s952_s25 = smov 0  }
   0x9   :  { %s954_s26 = smov 0   ;;  %s956_s27 = smov 0  }
   0xa LB: > { %s971_s28 = sadd.s32 4294967295, %s899_s27   ;;  %s594_s29 = sadd.s32 4294967294, %s899_s27   ;;  %s899_s27 = sphi %s956_s27, %s1187_s27   ;;  %s895_s26 = sphi %s954_s26, %s1186_s26   ;;  %s891_s25 = sphi %s952_s25, %s1185_s25   ;;  %s887_s24 = sphi %s950_s24, %s1184_s24  }
   0xb   : > { %p45_p0 = scmp.ne.s32.totalorder %s891_s25, %s887_s24  ;;  %p46_p1 = scmp.eq.s32.totalorder %s971_s28, 0 }
   0xc   : > { %p195_p2 = scmp.eq.s32.totalorder %s971_s28, 1  ;;  %p201_p3 = scmp.eq.s32.totalorder %s594_s29, 1 }
   0xd   : > { %p980_p4 = por %p46_p1, %p45_p0  ;;  %p595_p5 = scmp.ge.s32.totalorder %s899_s27, 1 }
   0xe   : > { %p985_p6 = por %p201_p3, %p45_p0  ;;  %p208_p7 = scmp.lt.s32.totalorder %s899_s27, 3 }
   0xf   : > { %s1175_s2 = sld [smem:[#allocation15_spill]]  ;;  %s901_s13 = smov [#allocation5]  }
  0x10   : > { %p993_p8 = pnand %p595_p5, %p208_p7  ;;  %s224_s14 = sshll.u32 %s901_s13, 4  ;;  %s225_s14 = int_to_ptr.vmem [resolvable:$true] %s224_s14 }
  0x11   : > { %s1178_s3 = sld [smem:[#allocation16_spill]]  ;;  %s1169_s19 = smov 128  }
  0x12   : > { %p638_p9 = pneg %p993_p8  ;;  %s1170_s20 = smov 8  }
  0x13   : > { %s904_s21 = smov [#allocation7]   ;;  %s250_s9 = sshll.u32 %s1165_s4, 4  ;;  %s251_s9 = int_to_ptr.hbm [resolvable:$true] %s250_s9 }
  0x14   : > { %p1001_p10 = pnand %p638_p9, %p46_p1  ;;  %s238_s22 = sshll.u32 %s904_s21, 4  ;;  %s239_s22 = int_to_ptr.vmem [resolvable:$true] %s238_s22 }
  0x15   : > { %s222_s11 = sshll.u32 %s1175_s2, 4  ;;  %s905_s10 = smov [#allocation8]   ;;  %s223_s11 = int_to_ptr.hbm [resolvable:$true] %s222_s11 }
  0x16   : > { %641 = dma.hbm_to_vmem [thread:$0]  (!%p1001_p10), %s223_s11, 256, %s225_s14, [#allocation6], %s1169_s19, %s1169_s19, %s1170_s20  }
  0x17   : > { %s236_s18 = sshll.u32 %s1178_s3, 4  ;;  %s252_s11 = sshll.u32 %s905_s10, 4  ;;  %s237_s18 = int_to_ptr.hbm [resolvable:$true] %s236_s18  ;;  %s253_s11 = int_to_ptr.vmem [resolvable:$true] %s252_s11 }
  0x18   : > { %644 = dma.hbm_to_vmem [thread:$0]  (!%p1001_p10), %s237_s18, 256, %s239_s22, [#allocation6], %s1169_s19, %s1169_s19, %s1170_s20  }
  0x19   : > { %s1023_s13 = sadd.s32 1, %s899_s27   ;;  %s32_s16 = sadd.s32 1, %s895_s26 }
  0x1a   : > { %647 = dma.hbm_to_vmem [thread:$0]  (!%p1001_p10), %s251_s9, 256, %s253_s11, [#allocation9], %s1169_s19, %s1169_s19, %s1170_s20  }
  0x1b   : > { %s29_s14 = ssub.s32 %s899_s27, %s1023_s13  ;;  %p39_p13 = scmp.ne.s32.totalorder %s895_s26, %s891_s25 }
  0x1c   : > { %p30_p12 = scmp.eq.s32.totalorder %s29_s14, 0  ;;  %p40_p0 = scmp.eq.s32.totalorder %s899_s27, 0 }
  0x1d   : > { %p659_p3 = scmp.lt.s32.totalorder %s899_s27, 2  ;;  %p1042_p7 = por %p195_p2, %p39_p13 }
  0x1e   : > { %s1038_s17 = scalar_select %p30_p12, %s895_s26, %s32_s16  }
  0x1f   : > { %p41_p5 = por %p40_p0, %p39_p13  ;;  %s272_s15 = sand.u32 1, %s895_s26  }
  0x20   : > { %s601_s21 = sshll.u32 %s899_s27, 3  ;;  %s600_s22 = sshll.u32 %s272_s15, 5 }
  0x21   : > { %s280_s9 = scalar_lea.hbm %s1161_s0, %s601_s21  ;;  %s276_s11 = scalar_lea.vmem [#allocation2], %s600_s22 }
  0x22   : > { %s281_s10 = sshll.u32 %s280_s9, 4  ;;  %s283_s14 = sshll.u32 %s276_s11, 4  ;;  %s282_s10 = int_to_ptr.hbm [resolvable:$true] %s281_s10  ;;  %s284_s14 = int_to_ptr.vmem [resolvable:$true] %s283_s14 }
  0x23   : > { %p1053_p9 = pnand %p659_p3, %p41_p5  ;;  %s273_s19 = scalar_lea.sflag [#allocation3], %s272_s15 }
  0x24   : > { %s795_s20 = sshra.s32 %s282_s10, 4  ;;  %s802_s23 = scalar_lea.hbm %s1161_s0, 64  ;;  %s796_s20 = int_to_ptr.hbm [resolvable:$true] %s795_s20 }
  0x25   : > { %s797_s2 = scalar_lea.hbm %s796_s20, 32  ;;  %p799_p10 = pneg %p1053_p9 }
  0x26   : > { %p798_p2 = scmp.ne.s32.totalorder %s796_s20, %s797_s2  ;;  %p803_p0 = scmp.lt.s32.totalorder %s796_s20, %s1161_s0 }
  0x27   : > { %p804_p3 = scmp.lt.s32.totalorder %s802_s23, %s797_s2 }
  0x28   : > { %p800_p12 = pnand %p799_p10, %p798_p2 }
  0x29   : > { %p805_p5 = por %p804_p3, %p803_p0 }
  0x2a   : > { %p801_p13 = pneg %p800_p12 }
  0x2c   : > { %p806_p11 = pnand %p805_p5, %p801_p13 }
  0x2e   : > { %809 = shalt.err (!%p806_p11)
}
  0x2f   : > { %s906_s15 = smov 256   ;;  %s1181_s11 = smov 8  }
  0x30   : > { %s1182_s3 = smov 128   ;;  %295 = sbr.rel (%p993_p8) target bundleno = 503 (0x1f7), region = 48 }
  0x31   : > { %651 = dma.hbm_to_vmem [thread:$0]  (!%p1053_p9), %s282_s10, 512, %s284_s14, %s273_s19, %s906_s15, %s1182_s3, %s1181_s11  }
  0x32   : > { %s1072_s21 = sand.u32 (!%p993_p8), 1, %s891_s25  }
  0x33   : > { %s603_s2 = sshll.u32 (!%p993_p8), %s1072_s21, 5  ;;  %s298_s20 = scalar_lea.sflag (!%p993_p8), [#allocation3], %s1072_s21 }
  0x34   : > { %s301_s22 = scalar_lea.vmem (!%p993_p8), [#allocation2], %s603_s2 }
  0x35   : > { %870 = dma.done.wait (%p980_p4), %s298_s20, 512  }
  0x36   : > { %872 = vsyncadd (%p980_p4), %s298_s20, 4294966784 }
  0x37   : > { %874 = dma.done.wait (%p46_p1), [#allocation6], 512  }
  0x38   : > { %876 = vsyncadd (%p46_p1), [#allocation6], 4294966784 }
  0x39   : > { %878 = dma.done.wait (%p46_p1), [#allocation9], 256  }
  0x3a   : > { %880 = vsyncadd (%p46_p1), [#allocation9], 4294967040  ;;  %v351_v0 = vld [vmem:[%s301_s22 + $0x18] sm:$0xff]  ;;  %v350_v1 = vld [vmem:[%s301_s22 + $0x10] sm:$0xff]  ;;  %vm356_vm0 = vcmask 261120   ;;  %vm392_vm1 = vcmask 130048  }
  0x3b   : > { %375 = vmatpush.msra.mxu0 %v351_v0  ;;  %v349_v2 = vld [vmem:[%s301_s22 + $0x8] sm:$0xff]  ;;  %v348_v3 = vld [vmem:[%s301_s22] sm:$0xff]  ;;  %v388_v14 = vld [vmem:[#allocation7] sm:$0xff]  ;;  %s347_s12 = scalar_lea.vmem [#allocation10], %s603_s2  ;;  %s617_s14 = sshll.u32 %s971_s28, 3 }
  0x3c   : > { %v352_v4 = vld [vmem:[%s1162_s1] sm:$0xff]  ;;  %v353_v5 = vld [vmem:[%s1162_s1 + $0x8] sm:$0xff]  ;;  %v389_v15 = vld [vmem:[#allocation7 + $0x8] sm:$0xff]  ;;  %s488_s29 = scalar_lea.hbm %s1168_s7, %s617_s14  ;;  %s489_s9 = sshll.u32 %s347_s12, 4  ;;  %s490_s9 = int_to_ptr.vmem [resolvable:$true] %s489_s9 }
  0x3d   : > { %376 = vmatpush.msra.mxu0 %v350_v1  ;;  %v354_v7 = vld [vmem:[#allocation5] sm:$0xff]  ;;  %v355_v8 = vld [vmem:[#allocation5 + $0x8] sm:$0xff]  ;;  %v426_v26 = vld [vmem:[%s1166_s5 + $0x10] sm:$0xff]  ;;  %s491_s15 = sshll.u32 %s488_s29, 4  ;;  %s478_s28 = scalar_lea.sflag [#allocation4], %s1072_s21  ;;  %s492_s15 = int_to_ptr.hbm [resolvable:$true] %s491_s15 }
  0x3e   : > { %v390_v17 = vld [vmem:[#allocation8] sm:$0xff]  ;;  %v391_v18 = vld [vmem:[#allocation8 + $0x8] sm:$0xff]  ;;  %v427_v27 = vld [vmem:[%s1166_s5 + $0x18] sm:$0xff]  ;;  %s839_s20 = sshra.s32 %s492_s15, 4  ;;  %s845_s19 = scalar_lea.hbm %s1168_s7, 64  ;;  %s840_s20 = int_to_ptr.hbm [resolvable:$true] %s839_s20 }
  0x3f   : > { %377 = vmatpush.msra.mxu0 %v349_v2  ;;  %v425_v24 = vld [vmem:[%s1166_s5 + $0x8] sm:$0xff]  ;;  %v424_v25 = vld [vmem:[%s1166_s5] sm:$0xff]  ;;  %v430_v34 = vld [vmem:[%s1167_s6 + $0x10] sm:$0xff]  ;;  %s841_s22 = scalar_lea.hbm %s840_s20, 32  ;;  %p846_p11 = scmp.lt.s32.totalorder %s840_s20, %s1168_s7 }
  0x40   : > { %v429_v28 = vld [vmem:[%s1167_s6 + $0x8] sm:$0xff]  ;;  %v428_v29 = vld [vmem:[%s1167_s6] sm:$0xff]  ;;  %v431_v37 = vld [vmem:[%s1167_s6 + $0x18] sm:$0xff]  ;;  %p842_p1 = scmp.ne.s32.totalorder %s840_s20, %s841_s22  ;;  %p847_p9 = scmp.lt.s32.totalorder %s845_s19, %s841_s22 }
  0x41   : > { %378 = vmatpush.msra.mxu0 %v348_v3 }
  0x42   : > { %608 = vmatmul.msk.f32.vlgmr.msra.gmra.mxu0 %vm356_vm0, %v352_v4  ;;  %p843_p4 = pnand %p842_p1, %p1042_p7  ;;  %p848_p2 = por %p847_p9, %p846_p11 }
  0x44   : > { %p844_p8 = pneg %p843_p4 }
  0x46   : > { %p849_p10 = pnand %p848_p2, %p844_p8 }
  0x4a   : > { %609 = vmatmul.msk.f32.gmra.mxu0 %vm356_vm0, %v353_v5 }
  0xbf   : > { %v380_v6 = vpop.f32.mrf.mxu0 }
  0xc0   : > { %v381_v10 = vadd.f32 %v380_v6, %v354_v7 }
  0xc2   : > { %v386_v13 = vmax.f32 %v381_v10, 0.0 }
  0xc7   : > { %v383_v9 = vpop.f32.mrf.mxu0 }
  0xc8   : > { %v384_v11 = vadd.f32 %v383_v9, %v355_v8 }
  0xca   : > { %v387_v12 = vmax.f32 %v384_v11, 0.0 }
  0xcc   : > { %413 = vmatpush.msra.mxu1 %v387_v12 }
  0xce   : > { %414 = vmatpush.msra.mxu1 %v386_v13 }
  0xcf   : > { %610 = vmatmul.msk.f32.vlgmr.msra.gmra.mxu1 %vm392_vm1, %v388_v14 }
  0xd7   : > { %611 = vmatmul.msk.f32.gmra.mxu1 %vm392_vm1, %v389_v15 }
 0x14c   : > { %v416_v16 = vpop.f32.mrf.mxu1 }
 0x14d   : > { %v417_v20 = vadd.f32 %v416_v16, %v390_v17 }
 0x14f   : > { %v422_v23 = vmax.f32 %v417_v20, 0.0 }
 0x154   : > { %v419_v19 = vpop.f32.mrf.mxu1 }
 0x155   : > { %v420_v21 = vadd.f32 %v419_v19, %v391_v18 }
 0x157   : > { %v423_v22 = vmax.f32 %v420_v21, 0.0 }
 0x159   : > { %458 = vmatpush.msra.mxu2 %v423_v22  ;;  %620 = vmatpush.msra.mxu3 %v423_v22 }
 0x15b   : > { %459 = vmatpush.msra.mxu2 %v422_v23  ;;  %621 = vmatpush.msra.mxu3 %v422_v23 }
 0x15c   : > { %613 = vmatmul.msk.f32.vlgmr.msra.gmra.mxu3 %vm392_vm1, %v425_v24  ;;  %612 = vmatmul.msk.f32.vlgmr.msra.gmra.mxu2 %vm392_vm1, %v424_v25 }
 0x164   : > { %614 = vmatmul.msk.f32.gmra.mxu3 %vm392_vm1, %v426_v26 }
 0x16c   : > { %615 = vmatmul.msk.f32.gmra.mxu3 %vm392_vm1, %v427_v27 }
 0x1df   : > { %v464_v30 = vpop.f32.mrf.mxu3  ;;  %v461_v31 = vpop.f32.mrf.mxu2 }
 0x1e0   : > { %v465_v32 = vadd.f32 %v464_v30, %v429_v28  ;;  %v462_v33 = vadd.f32 %v461_v31, %v428_v29 }
 0x1e2   : > { %474 = vst [vmem:[%s347_s12 + $0x8] sm:$0xff] %v465_v32 }
 0x1e3   : > { %473 = vst [vmem:[%s347_s12] sm:$0xff] %v462_v33 }
 0x1e7   : > { %v467_v35 = vpop.f32.mrf.mxu3 }
 0x1e8   : > { %v468_v36 = vadd.f32 %v467_v35, %v430_v34 }
 0x1ea   : > { %475 = vst [vmem:[%s347_s12 + $0x10] sm:$0xff] %v468_v36 }
 0x1ef   : > { %v470_v38 = vpop.f32.mrf.mxu3 }
 0x1f0   : > { %v471_v39 = vadd.f32 %v470_v38, %v431_v37 }
 0x1f2   : > { %476 = vst [vmem:[%s347_s12 + $0x18] sm:$0xff] %v471_v39 }
 0x1f3   : > { %852 = shalt.err (!%p849_p10)
}
 0x1f4   : > { %s907_s21 = smov 128   ;;  %s908_s12 = smov 256  }
 0x1f5   : > { %s909_s16 = smov 8  }
 0x1f6   : > { %636 = dma.vmem_to_hbm [thread:$0]  (%p1042_p7), %s490_s9, 512, %s492_s15, %s478_s28, %s907_s21, %s908_s12, %s909_s16  }
 0x1f7 PF: > { %s506_s23 = sand.u32 1, %s887_s24   ;;  %p1183_p12 = scmp.ge.s32.totalorder %s899_s27, 2 }
 0x1f8   : > { %s507_s29 = scalar_lea.sflag [#allocation4], %s506_s23 }
 0x1f9   : > { %p653_p13 = pnand %p1183_p12, %p985_p6 }
 0x1fb   : > { %p654_p0 = pneg %p653_p13 }
 0x1fd   : > { %882 = dma.done.wait (%p654_p0), %s507_s29, 512  }
 0x1fe   : > { %884 = vsyncadd (%p654_p0), %s507_s29, 4294966784  ;;  %p22_p3 = scmp.ge.s32.totalorder %s1023_s13, 4   ;;  %s1184_s24 = smov %s891_s25 }
 0x1ff   : > { %s1185_s25 = smov %s895_s26  ;;  %s1186_s26 = smov %s1038_s17 }
 0x200   : > { %s1187_s27 = smov %s1023_s13  ;;  %24 = sbr.rel (!%p22_p3) target bundleno = 10 (0xa), region = 105 }
 0x205   :  { %513 = vsyncpa [#allocation3], 1 }
 0x206   :  { %515 = vsyncpa [#allocation3 + $0x1], 1 }
 0x207   :  { %516 = vsyncpa [#allocation6], 1 }
 0x208   :  { %517 = vsyncpa [#allocation9], 1 }
 0x209   :  { %518 = vsyncpa [#allocation4], 1 }
 0x20a   :  { %520 = vsyncpa [#allocation4 + $0x1], 1 }

</bundles_post_ra>
